<compile_context>
chip_gen: v7x
topology: tpu7x:2x2x1
jax: 0.10.0
libtpu: 0.0.40
codegen_flags: <defaults>
</compile_context>

<pallas_src>
import jax
import jax.numpy as jnp
from jax import lax
from jax.experimental import pallas as pl
from jax.experimental.pallas import tpu as pltpu


def _make_lstm_chunk_kernel(T, H, slab_out, matmul_dtype):
    """Build the per-chunk LSTM recurrence kernel.

    Kernel refs:
      gx_ref : (T, B_blk, 4H)   precomputed x@W_ih^T + bias, gate order [i,f,o,g]
      whh_ref: (H, 4H)          recurrent weights (transposed), same gate order
      out_ref: slab_out -> (1, B_blk, T*H)   lane-dense slab (cols [s*H:(s+1)*H] = h_s)
               else     -> (T, B_blk, H)     direct (time-major) layout
      h_scr, c_scr: (B_blk, H) float32 state, persistent across time chunks
    """

    def kernel(gx_ref, whh_ref, out_ref, h_scr, c_scr):
        # Time axis is grid axis 1 (innermost): reset state at the start of the
        # sequence for every batch block.
        @pl.when(pl.program_id(1) == 0)
        def _():
            h_scr[...] = jnp.zeros_like(h_scr)
            c_scr[...] = jnp.zeros_like(c_scr)

        def step_fn(step, carry):
            h, c = carry
            # Recurrent matmul (MXU) in matmul_dtype, accumulate in f32.
            gates = gx_ref[step].astype(jnp.float32) + jnp.dot(
                h.astype(matmul_dtype), whh_ref[...],
                preferred_element_type=jnp.float32)            # (B_blk, 4H)

            # Gate order [i, f, o | g]: one sigmoid launch (3H lanes), one tanh (H).
            sig = jax.nn.sigmoid(gates[:, : 3 * H])
            g_g = jnp.tanh(gates[:, 3 * H:])
            i_g = sig[:, 0 * H:1 * H]
            f_g = sig[:, 1 * H:2 * H]
            o_g = sig[:, 2 * H:3 * H]

            c_new = f_g * c + i_g * g_g
            h_new = o_g * jnp.tanh(c_new)

            if slab_out:
                # Static lane offsets (step is a Python int on this path).
                out_ref[0, :, step * H:(step + 1) * H] = h_new.astype(out_ref.dtype)
            else:
                out_ref[step] = h_new.astype(out_ref.dtype)
            return (h_new, c_new)

        h = h_scr[...]
        c = c_scr[...]
        if slab_out:
            # Small H: fully static unroll keeps lane slices static.
            for s in range(T):
                h, c = step_fn(s, (h, c))
        else:
            # Larger H: visible loop with a small unroll factor keeps register
            # pressure flat while giving the LLO scheduler room to overlap.
            h, c = lax.fori_loop(0, T, step_fn, (h, c), unroll=min(T, 8))

        h_scr[...] = h
        c_scr[...] = c

    return kernel


def bdl_lstm_pallas(x_bdl, w_ih, w_hh, b_ih, b_hh, *, chunk=None,
                    batch_block=None, matmul_dtype=None):
    """x_bdl: (B, D_in, L) float32.  Returns (B, H, L) float32.

    w_ih: (4H, D_in), w_hh: (4H, H), b_ih/b_hh: (4H,)  (PyTorch LSTM layout,
    gate row order [i, f, g, o]).

    chunk       : timesteps per grid step (None -> auto-sized to VMEM budget,
                  preferring a divisor of L to avoid padded timesteps).
    batch_block : padded-batch rows per grid step (None -> whole padded batch).
                  Set to Bp//2 on v7x to shard batch over its 2 TensorCores.
    matmul_dtype: dtype of the recurrent-matmul operands (None -> bf16 when
                  H >= 128 else f32).  Gate math is always f32.
    """
    B, D, L = x_bdl.shape
    H = w_hh.shape[1]

    if matmul_dtype is None:
        matmul_dtype = jnp.bfloat16 if H >= 128 else jnp.float32
    mm_itemsize = jnp.dtype(matmul_dtype).itemsize

    # ---- Batch padding / blocking -----------------------------------------
    Bp = max(8, ((B + 7) // 8) * 8)                 # sublane multiple
    if batch_block is None:
        B_blk = Bp
    else:
        B_blk = max(8, ((batch_block + 7) // 8) * 8)
        B_blk = min(B_blk, Bp)
    Bp = ((Bp + B_blk - 1) // B_blk) * B_blk
    n_bblocks = Bp // B_blk

    # ---- Time chunking ------------------------------------------------------
    if chunk is not None:
        T = max(1, min(int(chunk), L))
    else:
        # Budget ~8 MiB per gx buffer (double-buffered by the pipeline).
        budget = 8 << 20
        t_cap = max(1, budget // max(1, B_blk * 4 * H * mm_itemsize))
        t_cap = int(min(t_cap, L, 64))
        T = 1
        for t in range(1, t_cap + 1):               # largest divisor of L <= cap
            if L % t == 0:
                T = t
        if T * 2 <= t_cap:                          # no good divisor: accept padding
            T = t_cap
    n_chunks = pl.cdiv(L, T)
    Lp = n_chunks * T
    # NOTE: padded timesteps (L..Lp) run a garbage recurrence (gx = bias) that
    # is sliced off below; harmless for forward hidden outputs only.

    # ---- Glue (plain JAX) ---------------------------------------------------
    # Reorder gate blocks from PyTorch's [i, f, g, o] to [i, f, o, g].
    idx = jnp.concatenate([
        jnp.arange(0 * H, 1 * H),
        jnp.arange(1 * H, 2 * H),
        jnp.arange(3 * H, 4 * H),
        jnp.arange(2 * H, 3 * H),
    ])
    wih_t = jnp.transpose(w_ih[idx], (1, 0))                      # (D, 4H)
    whh_t = jnp.transpose(w_hh[idx], (1, 0)).astype(matmul_dtype)  # (H, 4H)
    bias = (b_ih + b_hh)[idx]                                     # (4H,)

    # BDL -> LBD, pad length and batch.
    x_lbd = jnp.transpose(x_bdl, (2, 0, 1))                       # (L, B, D)
    x_lbd = jnp.pad(x_lbd, ((0, Lp - L), (0, Bp - B), (0, 0)))

    # Hoisted input projection: one big matmul at real MXU utilization (f32),
    # stored at matmul_dtype to halve the streamed HBM traffic when bf16.
    gx = (x_lbd.reshape(Lp * Bp, D) @ wih_t + bias)
    gx = gx.reshape(Lp, Bp, 4 * H).astype(matmul_dtype)           # (Lp, Bp, 4H)

    # ---- Output layout ------------------------------------------------------
    slab_out = (H % 128) != 0
    if slab_out:
        out_shape = jax.ShapeDtypeStruct((n_chunks, Bp, T * H), jnp.float32)
        out_spec = pl.BlockSpec((1, B_blk, T * H), lambda b, i: (i, b, 0))
    else:
        out_shape = jax.ShapeDtypeStruct((Lp, Bp, H), jnp.float32)
        out_spec = pl.BlockSpec((T, B_blk, H), lambda b, i: (i, b, 0))

    # ---- VMEM budget (re-derived per tiling; v7x only has 64 MiB physical) --
    gx_bytes = 2 * T * B_blk * 4 * H * mm_itemsize            # double-buffered
    whh_bytes = 1 * H * 4 * H * mm_itemsize                    # Buffered(1)
    out_bytes = 2 * T * B_blk * H * 4                          # double-buffered
    scr_bytes = 2 * B_blk * H * 4
    vmem_limit = int(1.5 * (gx_bytes + whh_bytes + out_bytes + scr_bytes)) + (8 << 20)
    vmem_limit = int(min(max(vmem_limit, 16 << 20), 64 << 20))

    kernel = _make_lstm_chunk_kernel(T, H, slab_out, matmul_dtype)

    out = pl.pallas_call(
        kernel,
        out_shape=out_shape,
        grid_spec=pltpu.PrefetchScalarGridSpec(
            num_scalar_prefetch=0,
            grid=(n_bblocks, n_chunks),           # time innermost (sequential)
            in_specs=[
                pl.BlockSpec((T, B_blk, 4 * H), lambda b, i: (i, b, 0)),
                # Constant weight: single-buffered, never re-fetched.
                pl.BlockSpec((H, 4 * H), lambda b, i: (0, 0),
                             pipeline_mode=pl.Buffered(1)),
            ],
            out_specs=out_spec,
            scratch_shapes=[
                pltpu.VMEM((B_blk, H), jnp.float32),   # h state
                pltpu.VMEM((B_blk, H), jnp.float32),   # c state
            ],
        ),
        compiler_params=pltpu.CompilerParams(
            dimension_semantics=("parallel", "arbitrary"),
            vmem_limit_bytes=vmem_limit),
    )(gx, whh_t)

    # ---- Unpack / crop ------------------------------------------------------
    if slab_out:
        out = out.reshape(n_chunks, Bp, T, H)
        out = jnp.transpose(out, (0, 2, 1, 3)).reshape(Lp, Bp, H)
    out = out[:L, :B, :]
    return jnp.transpose(out, (1, 2, 0))            # (B, H, L)


def bdl_lstm_reference(x_bdl, w_ih, w_hh, b_ih, b_hh):
    """Pure-JAX reference (lax.scan) mirroring torch.nn.LSTM semantics."""
    B, D, L = x_bdl.shape
    H = w_hh.shape[1]
    x_lbd = jnp.transpose(x_bdl, (2, 0, 1))
    bias = b_ih + b_hh

    def step(carry, x_t):
        h, c = carry
        gates = x_t @ w_ih.T + h @ w_hh.T + bias
        i_g = jax.nn.sigmoid(gates[:, 0 * H:1 * H])
        f_g = jax.nn.sigmoid(gates[:, 1 * H:2 * H])
        g_g = jnp.tanh(gates[:, 2 * H:3 * H])
        o_g = jax.nn.sigmoid(gates[:, 3 * H:4 * H])
        c_new = f_g * c + i_g * g_g
        h_new = o_g * jnp.tanh(c_new)
        return (h_new, c_new), h_new

    h0 = jnp.zeros((B, H), jnp.float32)
    c0 = jnp.zeros((B, H), jnp.float32)
    _, out_lbd = lax.scan(step, (h0, c0), x_lbd)
    return jnp.transpose(out_lbd, (1, 2, 0))


def _make_inputs(key, B, D_IN, L, H):
    k_x, k_wih, k_whh, k_bih, k_bhh = jax.random.split(key, 5)
    bound = 1.0 / jnp.sqrt(jnp.float32(H))   # PyTorch LSTM default init range
    x = jax.random.normal(k_x, (B, D_IN, L), dtype=jnp.float32)
    w_ih = jax.random.uniform(k_wih, (4 * H, D_IN), jnp.float32, -bound, bound)
    w_hh = jax.random.uniform(k_whh, (4 * H, H), jnp.float32, -bound, bound)
    b_ih = jax.random.uniform(k_bih, (4 * H,), jnp.float32, -bound, bound)
    b_hh = jax.random.uniform(k_bhh, (4 * H,), jnp.float32, -bound, bound)
    return x, w_ih, w_hh, b_ih, b_hh


if __name__ == "__main__":
    key = jax.random.PRNGKey(0)
    k1, k2 = jax.random.split(key, 2)

    # --- Test 1: small H (lane-dense slab output, f32 matmul), multi-chunk ---
    B, D_IN, L, H = 2, 4, 16, 32
    x, w_ih, w_hh, b_ih, b_hh = _make_inputs(k1, B, D_IN, L, H)
    out = bdl_lstm_pallas(x, w_ih, w_hh, b_ih, b_hh, chunk=8)
    out = jax.block_until_ready(out)
    ref = bdl_lstm_reference(x, w_ih, w_hh, b_ih, b_hh)
    assert out.shape == (B, H, L), out.shape
    assert jnp.allclose(out, ref, atol=1e-5, rtol=1e-5), "mismatch vs reference (H=32)"

    # --- Test 2: H multiple of 128 -> direct (L,B,H) output + bf16 operands --
    B2, D2, L2, H2 = 2, 4, 32, 128
    x2, w_ih2, w_hh2, b_ih2, b_hh2 = _make_inputs(k2, B2, D2, L2, H2)
    out2 = bdl_lstm_pallas(x2, w_ih2, w_hh2, b_ih2, b_hh2)   # auto chunk / bf16
    out2 = jax.block_until_ready(out2)
    ref2 = bdl_lstm_reference(x2, w_ih2, w_hh2, b_ih2, b_hh2)
    assert out2.shape == (B2, H2, L2), out2.shape
    assert jnp.allclose(out2, ref2, atol=2.5e-2, rtol=0.0), "mismatch vs reference (H=128, bf16)"

    print("KERNEL_OK")
</pallas_src>

<mosaic_0001>
module attributes {stable_mosaic.version = 11 : i64} {
  func.func @kernel(%arg0: i32, %arg1: i32, %arg2: memref<8x8x128xf32, #tpu.memory_space<vmem>>, %arg3: memref<32x128xf32, #tpu.memory_space<vmem>>, %arg4: memref<1x8x256xf32, #tpu.memory_space<vmem>>, %arg5: memref<8x32xf32, #tpu.memory_space<vmem>>, %arg6: memref<8x32xf32, #tpu.memory_space<vmem>>) attributes {dimension_semantics = [#tpu.dimension_semantics<parallel>, #tpu.dimension_semantics<arbitrary>], iteration_bounds = array<i64: 1, 2>, scalar_prefetch = 0 : i64, scratch_operands = 2 : i64, tpu.core_type = #tpu.core_type<tc>, window_params = [{transform_indices = @transform_0, window_bounds = array<i64: 8, 8, 128>}, {pipeline_mode = #tpu.pipeline_mode<synchronous>, transform_indices = @transform_1, window_bounds = array<i64: 32, 128>}, {transform_indices = @transform_2, window_bounds = array<i64: 1, 8, 256>}]} {
    %c0_i32 = arith.constant 0 : i32
    %0 = arith.cmpi eq, %arg1, %c0_i32 : i32
    %1 = arith.extui %0 : i1 to i32
    %c0_i32_0 = arith.constant 0 : i32
    %2 = arith.cmpi ne, %1, %c0_i32_0 : i32
    scf.if %2 {
      %cst_73 = arith.constant 0.000000e+00 : f32
      %199 = vector.broadcast %cst_73 : f32 to vector<8x32xf32>
      %c0_74 = arith.constant 0 : index
      %c0_75 = arith.constant 0 : index
      %200 = vector.load %arg5[%c0_74, %c0_75] : memref<8x32xf32, #tpu.memory_space<vmem>>, vector<8x32xf32>
      tpu.vector_store %arg5[%c0_74, %c0_75], %199 {strides = array<i32>} : memref<8x32xf32, #tpu.memory_space<vmem>>, vector<8x32xf32>,
      %cst_76 = arith.constant 0.000000e+00 : f32
      %201 = vector.broadcast %cst_76 : f32 to vector<8x32xf32>
      %c0_77 = arith.constant 0 : index
      %c0_78 = arith.constant 0 : index
      %202 = vector.load %arg6[%c0_77, %c0_78] : memref<8x32xf32, #tpu.memory_space<vmem>>, vector<8x32xf32>
      tpu.vector_store %arg6[%c0_77, %c0_78], %201 {strides = array<i32>} : memref<8x32xf32, #tpu.memory_space<vmem>>, vector<8x32xf32>,
    } else {
    }
    %c0 = arith.constant 0 : index
    %c0_1 = arith.constant 0 : index
    %3 = vector.load %arg5[%c0, %c0_1] : memref<8x32xf32, #tpu.memory_space<vmem>>, vector<8x32xf32>
    %c0_2 = arith.constant 0 : index
    %c0_3 = arith.constant 0 : index
    %4 = vector.load %arg6[%c0_2, %c0_3] : memref<8x32xf32, #tpu.memory_space<vmem>>, vector<8x32xf32>
    %c0_4 = arith.constant 0 : index
    %c0_5 = arith.constant 0 : index
    %c0_6 = arith.constant 0 : index
    %5 = vector.load %arg2[%c0_4, %c0_5, %c0_6] : memref<8x8x128xf32, #tpu.memory_space<vmem>>, vector<1x8x128xf32>
    %6 = vector.shape_cast %5 : vector<1x8x128xf32> to vector<8x128xf32>
    %c0_7 = arith.constant 0 : index
    %c0_8 = arith.constant 0 : index
    %7 = vector.load %arg3[%c0_7, %c0_8] : memref<32x128xf32, #tpu.memory_space<vmem>>, vector<32x128xf32>
    %cst = arith.constant dense<0.000000e+00> : vector<8x128xf32>
    %8 = tpu.matmul %3, %7, %cst {dimension_numbers = #tpu.dot_dimension_numbers<[1], [0], [0], [1], [0, 0, 1, 1], [], []>} : vector<8x32xf32>, vector<32x128xf32>, vector<8x128xf32> -> vector<8x128xf32>
    %9 = arith.addf %6, %8 : vector<8x128xf32>
    %10 = vector.extract_strided_slice %9 {offsets = [0, 0], sizes = [8, 96], strides = [1, 1]} : vector<8x128xf32> to vector<8x96xf32>
    %11 = arith.negf %10 : vector<8x96xf32>
    %12 = math.exp %11 : vector<8x96xf32>
    %cst_9 = arith.constant 1.000000e+00 : f32
    %13 = vector.broadcast %cst_9 : f32 to vector<8x96xf32>
    %14 = arith.addf %13, %12 : vector<8x96xf32>
    %15 = arith.divf %13, %14 : vector<8x96xf32>
    %16 = vector.extract_strided_slice %9 {offsets = [0, 96], sizes = [8, 32], strides = [1, 1]} : vector<8x128xf32> to vector<8x32xf32>
    %17 = math.tanh %16 : vector<8x32xf32>
    %18 = vector.extract_strided_slice %15 {offsets = [0, 0], sizes = [8, 32], strides = [1, 1]} : vector<8x96xf32> to vector<8x32xf32>
    %19 = vector.extract_strided_slice %15 {offsets = [0, 32], sizes = [8, 32], strides = [1, 1]} : vector<8x96xf32> to vector<8x32xf32>
    %20 = vector.extract_strided_slice %15 {offsets = [0, 64], sizes = [8, 32], strides = [1, 1]} : vector<8x96xf32> to vector<8x32xf32>
    %21 = arith.mulf %19, %4 : vector<8x32xf32>
    %22 = arith.mulf %18, %17 : vector<8x32xf32>
    %23 = arith.addf %21, %22 : vector<8x32xf32>
    %24 = math.tanh %23 : vector<8x32xf32>
    %25 = arith.mulf %20, %24 : vector<8x32xf32>
    %c0_10 = arith.constant 0 : index
    %c0_11 = arith.constant 0 : index
    %c0_12 = arith.constant 0 : index
    %26 = vector.load %arg4[%c0_10, %c0_11, %c0_12] : memref<1x8x256xf32, #tpu.memory_space<vmem>>, vector<1x8x32xf32>
    %27 = vector.shape_cast %26 : vector<1x8x32xf32> to vector<8x32xf32>
    %28 = vector.shape_cast %25 : vector<8x32xf32> to vector<1x8x32xf32>
    tpu.vector_store %arg4[%c0_10, %c0_11, %c0_12], %28 {strides = array<i32>} : memref<1x8x256xf32, #tpu.memory_space<vmem>>, vector<1x8x32xf32>,
    %c1 = arith.constant 1 : index
    %c0_13 = arith.constant 0 : index
    %c0_14 = arith.constant 0 : index
    %29 = vector.load %arg2[%c1, %c0_13, %c0_14] : memref<8x8x128xf32, #tpu.memory_space<vmem>>, vector<1x8x128xf32>
    %30 = vector.shape_cast %29 : vector<1x8x128xf32> to vector<8x128xf32>
    %c0_15 = arith.constant 0 : index
    %c0_16 = arith.constant 0 : index
    %31 = vector.load %arg3[%c0_15, %c0_16] : memref<32x128xf32, #tpu.memory_space<vmem>>, vector<32x128xf32>
    %cst_17 = arith.constant dense<0.000000e+00> : vector<8x128xf32>
    %32 = tpu.matmul %25, %31, %cst_17 {dimension_numbers = #tpu.dot_dimension_numbers<[1], [0], [0], [1], [0, 0, 1, 1], [], []>} : vector<8x32xf32>, vector<32x128xf32>, vector<8x128xf32> -> vector<8x128xf32>
    %33 = arith.addf %30, %32 : vector<8x128xf32>
    %34 = vector.extract_strided_slice %33 {offsets = [0, 0], sizes = [8, 96], strides = [1, 1]} : vector<8x128xf32> to vector<8x96xf32>
    %35 = arith.negf %34 : vector<8x96xf32>
    %36 = math.exp %35 : vector<8x96xf32>
    %cst_18 = arith.constant 1.000000e+00 : f32
    %37 = vector.broadcast %cst_18 : f32 to vector<8x96xf32>
    %38 = arith.addf %37, %36 : vector<8x96xf32>
    %39 = arith.divf %37, %38 : vector<8x96xf32>
    %40 = vector.extract_strided_slice %33 {offsets = [0, 96], sizes = [8, 32], strides = [1, 1]} : vector<8x128xf32> to vector<8x32xf32>
    %41 = math.tanh %40 : vector<8x32xf32>
    %42 = vector.extract_strided_slice %39 {offsets = [0, 0], sizes = [8, 32], strides = [1, 1]} : vector<8x96xf32> to vector<8x32xf32>
    %43 = vector.extract_strided_slice %39 {offsets = [0, 32], sizes = [8, 32], strides = [1, 1]} : vector<8x96xf32> to vector<8x32xf32>
    %44 = vector.extract_strided_slice %39 {offsets = [0, 64], sizes = [8, 32], strides = [1, 1]} : vector<8x96xf32> to vector<8x32xf32>
    %45 = arith.mulf %43, %23 : vector<8x32xf32>
    %46 = arith.mulf %42, %41 : vector<8x32xf32>
    %47 = arith.addf %45, %46 : vector<8x32xf32>
    %48 = math.tanh %47 : vector<8x32xf32>
    %49 = arith.mulf %44, %48 : vector<8x32xf32>
    %c0_19 = arith.constant 0 : index
    %c0_20 = arith.constant 0 : index
    %c32 = arith.constant 32 : index
    %50 = vector.load %arg4[%c0_19, %c0_20, %c32] : memref<1x8x256xf32, #tpu.memory_space<vmem>>, vector<1x8x32xf32>
    %51 = vector.shape_cast %50 : vector<1x8x32xf32> to vector<8x32xf32>
    %52 = vector.shape_cast %49 : vector<8x32xf32> to vector<1x8x32xf32>
    tpu.vector_store %arg4[%c0_19, %c0_20, %c32], %52 {strides = array<i32>} : memref<1x8x256xf32, #tpu.memory_space<vmem>>, vector<1x8x32xf32>,
    %c2 = arith.constant 2 : index
    %c0_21 = arith.constant 0 : index
    %c0_22 = arith.constant 0 : index
    %53 = vector.load %arg2[%c2, %c0_21, %c0_22] : memref<8x8x128xf32, #tpu.memory_space<vmem>>, vector<1x8x128xf32>
    %54 = vector.shape_cast %53 : vector<1x8x128xf32> to vector<8x128xf32>
    %c0_23 = arith.constant 0 : index
    %c0_24 = arith.constant 0 : index
    %55 = vector.load %arg3[%c0_23, %c0_24] : memref<32x128xf32, #tpu.memory_space<vmem>>, vector<32x128xf32>
    %cst_25 = arith.constant dense<0.000000e+00> : vector<8x128xf32>
    %56 = tpu.matmul %49, %55, %cst_25 {dimension_numbers = #tpu.dot_dimension_numbers<[1], [0], [0], [1], [0, 0, 1, 1], [], []>} : vector<8x32xf32>, vector<32x128xf32>, vector<8x128xf32> -> vector<8x128xf32>
    %57 = arith.addf %54, %56 : vector<8x128xf32>
    %58 = vector.extract_strided_slice %57 {offsets = [0, 0], sizes = [8, 96], strides = [1, 1]} : vector<8x128xf32> to vector<8x96xf32>
    %59 = arith.negf %58 : vector<8x96xf32>
    %60 = math.exp %59 : vector<8x96xf32>
    %cst_26 = arith.constant 1.000000e+00 : f32
    %61 = vector.broadcast %cst_26 : f32 to vector<8x96xf32>
    %62 = arith.addf %61, %60 : vector<8x96xf32>
    %63 = arith.divf %61, %62 : vector<8x96xf32>
    %64 = vector.extract_strided_slice %57 {offsets = [0, 96], sizes = [8, 32], strides = [1, 1]} : vector<8x128xf32> to vector<8x32xf32>
    %65 = math.tanh %64 : vector<8x32xf32>
    %66 = vector.extract_strided_slice %63 {offsets = [0, 0], sizes = [8, 32], strides = [1, 1]} : vector<8x96xf32> to vector<8x32xf32>
    %67 = vector.extract_strided_slice %63 {offsets = [0, 32], sizes = [8, 32], strides = [1, 1]} : vector<8x96xf32> to vector<8x32xf32>
    %68 = vector.extract_strided_slice %63 {offsets = [0, 64], sizes = [8, 32], strides = [1, 1]} : vector<8x96xf32> to vector<8x32xf32>
    %69 = arith.mulf %67, %47 : vector<8x32xf32>
    %70 = arith.mulf %66, %65 : vector<8x32xf32>
    %71 = arith.addf %69, %70 : vector<8x32xf32>
    %72 = math.tanh %71 : vector<8x32xf32>
    %73 = arith.mulf %68, %72 : vector<8x32xf32>
    %c0_27 = arith.constant 0 : index
    %c0_28 = arith.constant 0 : index
    %c64 = arith.constant 64 : index
    %74 = vector.load %arg4[%c0_27, %c0_28, %c64] : memref<1x8x256xf32, #tpu.memory_space<vmem>>, vector<1x8x32xf32>
    %75 = vector.shape_cast %74 : vector<1x8x32xf32> to vector<8x32xf32>
    %76 = vector.shape_cast %73 : vector<8x32xf32> to vector<1x8x32xf32>
    tpu.vector_store %arg4[%c0_27, %c0_28, %c64], %76 {strides = array<i32>} : memref<1x8x256xf32, #tpu.memory_space<vmem>>, vector<1x8x32xf32>,
    %c3 = arith.constant 3 : index
    %c0_29 = arith.constant 0 : index
    %c0_30 = arith.constant 0 : index
    %77 = vector.load %arg2[%c3, %c0_29, %c0_30] : memref<8x8x128xf32, #tpu.memory_space<vmem>>, vector<1x8x128xf32>
    %78 = vector.shape_cast %77 : vector<1x8x128xf32> to vector<8x128xf32>
    %c0_31 = arith.constant 0 : index
    %c0_32 = arith.constant 0 : index
    %79 = vector.load %arg3[%c0_31, %c0_32] : memref<32x128xf32, #tpu.memory_space<vmem>>, vector<32x128xf32>
    %cst_33 = arith.constant dense<0.000000e+00> : vector<8x128xf32>
    %80 = tpu.matmul %73, %79, %cst_33 {dimension_numbers = #tpu.dot_dimension_numbers<[1], [0], [0], [1], [0, 0, 1, 1], [], []>} : vector<8x32xf32>, vector<32x128xf32>, vector<8x128xf32> -> vector<8x128xf32>
    %81 = arith.addf %78, %80 : vector<8x128xf32>
    %82 = vector.extract_strided_slice %81 {offsets = [0, 0], sizes = [8, 96], strides = [1, 1]} : vector<8x128xf32> to vector<8x96xf32>
    %83 = arith.negf %82 : vector<8x96xf32>
    %84 = math.exp %83 : vector<8x96xf32>
    %cst_34 = arith.constant 1.000000e+00 : f32
    %85 = vector.broadcast %cst_34 : f32 to vector<8x96xf32>
    %86 = arith.addf %85, %84 : vector<8x96xf32>
    %87 = arith.divf %85, %86 : vector<8x96xf32>
    %88 = vector.extract_strided_slice %81 {offsets = [0, 96], sizes = [8, 32], strides = [1, 1]} : vector<8x128xf32> to vector<8x32xf32>
    %89 = math.tanh %88 : vector<8x32xf32>
    %90 = vector.extract_strided_slice %87 {offsets = [0, 0], sizes = [8, 32], strides = [1, 1]} : vector<8x96xf32> to vector<8x32xf32>
    %91 = vector.extract_strided_slice %87 {offsets = [0, 32], sizes = [8, 32], strides = [1, 1]} : vector<8x96xf32> to vector<8x32xf32>
    %92 = vector.extract_strided_slice %87 {offsets = [0, 64], sizes = [8, 32], strides = [1, 1]} : vector<8x96xf32> to vector<8x32xf32>
    %93 = arith.mulf %91, %71 : vector<8x32xf32>
    %94 = arith.mulf %90, %89 : vector<8x32xf32>
    %95 = arith.addf %93, %94 : vector<8x32xf32>
    %96 = math.tanh %95 : vector<8x32xf32>
    %97 = arith.mulf %92, %96 : vector<8x32xf32>
    %c0_35 = arith.constant 0 : index
    %c0_36 = arith.constant 0 : index
    %c96 = arith.constant 96 : index
    %98 = vector.load %arg4[%c0_35, %c0_36, %c96] : memref<1x8x256xf32, #tpu.memory_space<vmem>>, vector<1x8x32xf32>
    %99 = vector.shape_cast %98 : vector<1x8x32xf32> to vector<8x32xf32>
    %100 = vector.shape_cast %97 : vector<8x32xf32> to vector<1x8x32xf32>
    tpu.vector_store %arg4[%c0_35, %c0_36, %c96], %100 {strides = array<i32>} : memref<1x8x256xf32, #tpu.memory_space<vmem>>, vector<1x8x32xf32>,
    %c4 = arith.constant 4 : index
    %c0_37 = arith.constant 0 : index
    %c0_38 = arith.constant 0 : index
    %101 = vector.load %arg2[%c4, %c0_37, %c0_38] : memref<8x8x128xf32, #tpu.memory_space<vmem>>, vector<1x8x128xf32>
    %102 = vector.shape_cast %101 : vector<1x8x128xf32> to vector<8x128xf32>
    %c0_39 = arith.constant 0 : index
    %c0_40 = arith.constant 0 : index
    %103 = vector.load %arg3[%c0_39, %c0_40] : memref<32x128xf32, #tpu.memory_space<vmem>>, vector<32x128xf32>
    %cst_41 = arith.constant dense<0.000000e+00> : vector<8x128xf32>
    %104 = tpu.matmul %97, %103, %cst_41 {dimension_numbers = #tpu.dot_dimension_numbers<[1], [0], [0], [1], [0, 0, 1, 1], [], []>} : vector<8x32xf32>, vector<32x128xf32>, vector<8x128xf32> -> vector<8x128xf32>
    %105 = arith.addf %102, %104 : vector<8x128xf32>
    %106 = vector.extract_strided_slice %105 {offsets = [0, 0], sizes = [8, 96], strides = [1, 1]} : vector<8x128xf32> to vector<8x96xf32>
    %107 = arith.negf %106 : vector<8x96xf32>
    %108 = math.exp %107 : vector<8x96xf32>
    %cst_42 = arith.constant 1.000000e+00 : f32
    %109 = vector.broadcast %cst_42 : f32 to vector<8x96xf32>
    %110 = arith.addf %109, %108 : vector<8x96xf32>
    %111 = arith.divf %109, %110 : vector<8x96xf32>
    %112 = vector.extract_strided_slice %105 {offsets = [0, 96], sizes = [8, 32], strides = [1, 1]} : vector<8x128xf32> to vector<8x32xf32>
    %113 = math.tanh %112 : vector<8x32xf32>
    %114 = vector.extract_strided_slice %111 {offsets = [0, 0], sizes = [8, 32], strides = [1, 1]} : vector<8x96xf32> to vector<8x32xf32>
    %115 = vector.extract_strided_slice %111 {offsets = [0, 32], sizes = [8, 32], strides = [1, 1]} : vector<8x96xf32> to vector<8x32xf32>
    %116 = vector.extract_strided_slice %111 {offsets = [0, 64], sizes = [8, 32], strides = [1, 1]} : vector<8x96xf32> to vector<8x32xf32>
    %117 = arith.mulf %115, %95 : vector<8x32xf32>
    %118 = arith.mulf %114, %113 : vector<8x32xf32>
    %119 = arith.addf %117, %118 : vector<8x32xf32>
    %120 = math.tanh %119 : vector<8x32xf32>
    %121 = arith.mulf %116, %120 : vector<8x32xf32>
    %c0_43 = arith.constant 0 : index
    %c0_44 = arith.constant 0 : index
    %c128 = arith.constant 128 : index
    %122 = vector.load %arg4[%c0_43, %c0_44, %c128] : memref<1x8x256xf32, #tpu.memory_space<vmem>>, vector<1x8x32xf32>
    %123 = vector.shape_cast %122 : vector<1x8x32xf32> to vector<8x32xf32>
    %124 = vector.shape_cast %121 : vector<8x32xf32> to vector<1x8x32xf32>
    tpu.vector_store %arg4[%c0_43, %c0_44, %c128], %124 {strides = array<i32>} : memref<1x8x256xf32, #tpu.memory_space<vmem>>, vector<1x8x32xf32>,
    %c5 = arith.constant 5 : index
    %c0_45 = arith.constant 0 : index
    %c0_46 = arith.constant 0 : index
    %125 = vector.load %arg2[%c5, %c0_45, %c0_46] : memref<8x8x128xf32, #tpu.memory_space<vmem>>, vector<1x8x128xf32>
    %126 = vector.shape_cast %125 : vector<1x8x128xf32> to vector<8x128xf32>
    %c0_47 = arith.constant 0 : index
    %c0_48 = arith.constant 0 : index
    %127 = vector.load %arg3[%c0_47, %c0_48] : memref<32x128xf32, #tpu.memory_space<vmem>>, vector<32x128xf32>
    %cst_49 = arith.constant dense<0.000000e+00> : vector<8x128xf32>
    %128 = tpu.matmul %121, %127, %cst_49 {dimension_numbers = #tpu.dot_dimension_numbers<[1], [0], [0], [1], [0, 0, 1, 1], [], []>} : vector<8x32xf32>, vector<32x128xf32>, vector<8x128xf32> -> vector<8x128xf32>
    %129 = arith.addf %126, %128 : vector<8x128xf32>
    %130 = vector.extract_strided_slice %129 {offsets = [0, 0], sizes = [8, 96], strides = [1, 1]} : vector<8x128xf32> to vector<8x96xf32>
    %131 = arith.negf %130 : vector<8x96xf32>
    %132 = math.exp %131 : vector<8x96xf32>
    %cst_50 = arith.constant 1.000000e+00 : f32
    %133 = vector.broadcast %cst_50 : f32 to vector<8x96xf32>
    %134 = arith.addf %133, %132 : vector<8x96xf32>
    %135 = arith.divf %133, %134 : vector<8x96xf32>
    %136 = vector.extract_strided_slice %129 {offsets = [0, 96], sizes = [8, 32], strides = [1, 1]} : vector<8x128xf32> to vector<8x32xf32>
    %137 = math.tanh %136 : vector<8x32xf32>
    %138 = vector.extract_strided_slice %135 {offsets = [0, 0], sizes = [8, 32], strides = [1, 1]} : vector<8x96xf32> to vector<8x32xf32>
    %139 = vector.extract_strided_slice %135 {offsets = [0, 32], sizes = [8, 32], strides = [1, 1]} : vector<8x96xf32> to vector<8x32xf32>
    %140 = vector.extract_strided_slice %135 {offsets = [0, 64], sizes = [8, 32], strides = [1, 1]} : vector<8x96xf32> to vector<8x32xf32>
    %141 = arith.mulf %139, %119 : vector<8x32xf32>
    %142 = arith.mulf %138, %137 : vector<8x32xf32>
    %143 = arith.addf %141, %142 : vector<8x32xf32>
    %144 = math.tanh %143 : vector<8x32xf32>
    %145 = arith.mulf %140, %144 : vector<8x32xf32>
    %c0_51 = arith.constant 0 : index
    %c0_52 = arith.constant 0 : index
    %c160 = arith.constant 160 : index
    %146 = vector.load %arg4[%c0_51, %c0_52, %c160] : memref<1x8x256xf32, #tpu.memory_space<vmem>>, vector<1x8x32xf32>
    %147 = vector.shape_cast %146 : vector<1x8x32xf32> to vector<8x32xf32>
    %148 = vector.shape_cast %145 : vector<8x32xf32> to vector<1x8x32xf32>
    tpu.vector_store %arg4[%c0_51, %c0_52, %c160], %148 {strides = array<i32>} : memref<1x8x256xf32, #tpu.memory_space<vmem>>, vector<1x8x32xf32>,
    %c6 = arith.constant 6 : index
    %c0_53 = arith.constant 0 : index
    %c0_54 = arith.constant 0 : index
    %149 = vector.load %arg2[%c6, %c0_53, %c0_54] : memref<8x8x128xf32, #tpu.memory_space<vmem>>, vector<1x8x128xf32>
    %150 = vector.shape_cast %149 : vector<1x8x128xf32> to vector<8x128xf32>
    %c0_55 = arith.constant 0 : index
    %c0_56 = arith.constant 0 : index
    %151 = vector.load %arg3[%c0_55, %c0_56] : memref<32x128xf32, #tpu.memory_space<vmem>>, vector<32x128xf32>
    %cst_57 = arith.constant dense<0.000000e+00> : vector<8x128xf32>
    %152 = tpu.matmul %145, %151, %cst_57 {dimension_numbers = #tpu.dot_dimension_numbers<[1], [0], [0], [1], [0, 0, 1, 1], [], []>} : vector<8x32xf32>, vector<32x128xf32>, vector<8x128xf32> -> vector<8x128xf32>
    %153 = arith.addf %150, %152 : vector<8x128xf32>
    %154 = vector.extract_strided_slice %153 {offsets = [0, 0], sizes = [8, 96], strides = [1, 1]} : vector<8x128xf32> to vector<8x96xf32>
    %155 = arith.negf %154 : vector<8x96xf32>
    %156 = math.exp %155 : vector<8x96xf32>
    %cst_58 = arith.constant 1.000000e+00 : f32
    %157 = vector.broadcast %cst_58 : f32 to vector<8x96xf32>
    %158 = arith.addf %157, %156 : vector<8x96xf32>
    %159 = arith.divf %157, %158 : vector<8x96xf32>
    %160 = vector.extract_strided_slice %153 {offsets = [0, 96], sizes = [8, 32], strides = [1, 1]} : vector<8x128xf32> to vector<8x32xf32>
    %161 = math.tanh %160 : vector<8x32xf32>
    %162 = vector.extract_strided_slice %159 {offsets = [0, 0], sizes = [8, 32], strides = [1, 1]} : vector<8x96xf32> to vector<8x32xf32>
    %163 = vector.extract_strided_slice %159 {offsets = [0, 32], sizes = [8, 32], strides = [1, 1]} : vector<8x96xf32> to vector<8x32xf32>
    %164 = vector.extract_strided_slice %159 {offsets = [0, 64], sizes = [8, 32], strides = [1, 1]} : vector<8x96xf32> to vector<8x32xf32>
    %165 = arith.mulf %163, %143 : vector<8x32xf32>
    %166 = arith.mulf %162, %161 : vector<8x32xf32>
    %167 = arith.addf %165, %166 : vector<8x32xf32>
    %168 = math.tanh %167 : vector<8x32xf32>
    %169 = arith.mulf %164, %168 : vector<8x32xf32>
    %c0_59 = arith.constant 0 : index
    %c0_60 = arith.constant 0 : index
    %c192 = arith.constant 192 : index
    %170 = vector.load %arg4[%c0_59, %c0_60, %c192] : memref<1x8x256xf32, #tpu.memory_space<vmem>>, vector<1x8x32xf32>
    %171 = vector.shape_cast %170 : vector<1x8x32xf32> to vector<8x32xf32>
    %172 = vector.shape_cast %169 : vector<8x32xf32> to vector<1x8x32xf32>
    tpu.vector_store %arg4[%c0_59, %c0_60, %c192], %172 {strides = array<i32>} : memref<1x8x256xf32, #tpu.memory_space<vmem>>, vector<1x8x32xf32>,
    %c7 = arith.constant 7 : index
    %c0_61 = arith.constant 0 : index
    %c0_62 = arith.constant 0 : index
    %173 = vector.load %arg2[%c7, %c0_61, %c0_62] : memref<8x8x128xf32, #tpu.memory_space<vmem>>, vector<1x8x128xf32>
    %174 = vector.shape_cast %173 : vector<1x8x128xf32> to vector<8x128xf32>
    %c0_63 = arith.constant 0 : index
    %c0_64 = arith.constant 0 : index
    %175 = vector.load %arg3[%c0_63, %c0_64] : memref<32x128xf32, #tpu.memory_space<vmem>>, vector<32x128xf32>
    %cst_65 = arith.constant dense<0.000000e+00> : vector<8x128xf32>
    %176 = tpu.matmul %169, %175, %cst_65 {dimension_numbers = #tpu.dot_dimension_numbers<[1], [0], [0], [1], [0, 0, 1, 1], [], []>} : vector<8x32xf32>, vector<32x128xf32>, vector<8x128xf32> -> vector<8x128xf32>
    %177 = arith.addf %174, %176 : vector<8x128xf32>
    %178 = vector.extract_strided_slice %177 {offsets = [0, 0], sizes = [8, 96], strides = [1, 1]} : vector<8x128xf32> to vector<8x96xf32>
    %179 = arith.negf %178 : vector<8x96xf32>
    %180 = math.exp %179 : vector<8x96xf32>
    %cst_66 = arith.constant 1.000000e+00 : f32
    %181 = vector.broadcast %cst_66 : f32 to vector<8x96xf32>
    %182 = arith.addf %181, %180 : vector<8x96xf32>
    %183 = arith.divf %181, %182 : vector<8x96xf32>
    %184 = vector.extract_strided_slice %177 {offsets = [0, 96], sizes = [8, 32], strides = [1, 1]} : vector<8x128xf32> to vector<8x32xf32>
    %185 = math.tanh %184 : vector<8x32xf32>
    %186 = vector.extract_strided_slice %183 {offsets = [0, 0], sizes = [8, 32], strides = [1, 1]} : vector<8x96xf32> to vector<8x32xf32>
    %187 = vector.extract_strided_slice %183 {offsets = [0, 32], sizes = [8, 32], strides = [1, 1]} : vector<8x96xf32> to vector<8x32xf32>
    %188 = vector.extract_strided_slice %183 {offsets = [0, 64], sizes = [8, 32], strides = [1, 1]} : vector<8x96xf32> to vector<8x32xf32>
    %189 = arith.mulf %187, %167 : vector<8x32xf32>
    %190 = arith.mulf %186, %185 : vector<8x32xf32>
    %191 = arith.addf %189, %190 : vector<8x32xf32>
    %192 = math.tanh %191 : vector<8x32xf32>
    %193 = arith.mulf %188, %192 : vector<8x32xf32>
    %c0_67 = arith.constant 0 : index
    %c0_68 = arith.constant 0 : index
    %c224 = arith.constant 224 : index
    %194 = vector.load %arg4[%c0_67, %c0_68, %c224] : memref<1x8x256xf32, #tpu.memory_space<vmem>>, vector<1x8x32xf32>
    %195 = vector.shape_cast %194 : vector<1x8x32xf32> to vector<8x32xf32>
    %196 = vector.shape_cast %193 : vector<8x32xf32> to vector<1x8x32xf32>
    tpu.vector_store %arg4[%c0_67, %c0_68, %c224], %196 {strides = array<i32>} : memref<1x8x256xf32, #tpu.memory_space<vmem>>, vector<1x8x32xf32>,
    %c0_69 = arith.constant 0 : index
    %c0_70 = arith.constant 0 : index
    %197 = vector.load %arg5[%c0_69, %c0_70] : memref<8x32xf32, #tpu.memory_space<vmem>>, vector<8x32xf32>
    tpu.vector_store %arg5[%c0_69, %c0_70], %193 {strides = array<i32>} : memref<8x32xf32, #tpu.memory_space<vmem>>, vector<8x32xf32>,
    %c0_71 = arith.constant 0 : index
    %c0_72 = arith.constant 0 : index
    %198 = vector.load %arg6[%c0_71, %c0_72] : memref<8x32xf32, #tpu.memory_space<vmem>>, vector<8x32xf32>
    tpu.vector_store %arg6[%c0_71, %c0_72], %191 {strides = array<i32>} : memref<8x32xf32, #tpu.memory_space<vmem>>, vector<8x32xf32>,
    return
  }
  func.func @transform_0(%arg0: i32, %arg1: i32) -> (i32, i32, i32) {
    %c0_i32 = arith.constant 0 : i32
    %c0_i32_0 = arith.constant 0 : i32
    return %arg1, %arg0, %c0_i32 : i32, i32, i32
  }
  func.func @transform_1(%arg0: i32, %arg1: i32) -> (i32, i32) {
    %c0_i32 = arith.constant 0 : i32
    %c0_i32_0 = arith.constant 0 : i32
    %c0_i32_1 = arith.constant 0 : i32
    return %c0_i32, %c0_i32_0 : i32, i32
  }
  func.func @transform_2(%arg0: i32, %arg1: i32) -> (i32, i32, i32) {
    %c0_i32 = arith.constant 0 : i32
    %c0_i32_0 = arith.constant 0 : i32
    return %arg1, %arg0, %c0_i32 : i32, i32, i32
  }
}

</mosaic_0001>

<bundles_post_ra>
// kernel: tpu_custom_call.1
= control target key start
LH: loop header
LB: loop body
LE: loop exit
PB: predicated region body
PF: predicated region fallthrough
CT: control target
= control target key end

     0   :  { %7 = vsyncpa [#allocation5], 0  ;;  %s2104_s0 = inlined_call_operand.hbm [shape: f32[16,8,128], index: 0, kind: input, shape index: {}]   ;;  %s2105_s1 = inlined_call_operand.hbm [shape: f32[32,128], index: 1, kind: input, shape index: {}]   ;;  %s2106_s2 = inlined_call_operand.hbm [shape: f32[2,8,256], index: 2, kind: output, shape index: {}]  }
   0x1   :  { %9 = vsyncpa [#allocation5 + $0x1], 0 }
   0x2   :  { %10 = vsyncpa [#allocation8], 0 }
   0x3   :  { %11 = vsyncpa [#allocation6], 0 }
   0x4   :  { %13 = vsyncpa [#allocation6 + $0x1], 0  ;;  %s1737_s9 = smov 0   ;;  %s1739_s10 = smov 0  }
   0x5   :  { %s1741_s11 = smov 0   ;;  %s1743_s12 = smov 0  }
   0x6   :  { %s1745_s13 = smov 0   ;;  %s1747_s14 = smov 0  }
   0x7 LB: > { %s1199_s15 = sadd.s32 4294967295, %s1708_s14   ;;  %s1200_s16 = sadd.s32 4294967294, %s1708_s14   ;;  %s1708_s14 = sphi %s1747_s14, %s19_s14   ;;  %s1704_s13 = sphi %s1745_s13, %s2130_s13   ;;  %s1700_s12 = sphi %s1743_s12, %s2129_s12   ;;  %s1696_s11 = sphi %s1741_s11, %s2128_s11   ;;  %s1692_s10 = sphi %s1739_s10, %s2127_s10   ;;  %s1688_s9 = sphi %s1737_s9, %s2126_s9  }
   0x8   : > { %p53_p0 = scmp.ne.s32.totalorder %s1692_s10, %s1688_s9  ;;  %p1771_p1 = scmp.eq.s32.totalorder %s1199_s15, 0 }
   0x9   : > { %p1775_p2 = scmp.eq.s32.totalorder %s1199_s15, 1  ;;  %p106_p3 = scmp.eq.s32.totalorder %s1200_s16, 1 }
   0xa   : > { %s2111_s17 = scalar_select %p1771_p1, 1, 0 }
   0xb   : > { %s2112_s18 = scalar_select %p1775_p2, 1, 0 }
   0xc   : > { %p1781_p4 = por %p1771_p1, %p53_p0  ;;  %p1201_p5 = scmp.ge.s32.totalorder %s1708_s14, 1 }
   0xd   : > { %p1786_p6 = por %p106_p3, %p53_p0  ;;  %p113_p7 = scmp.lt.s32.totalorder %s1708_s14, 3 }
   0xe   : > { %s2113_s19 = scalar_select %p1781_p4, 1, 0 }
   0xf   : > { %s2114_s20 = scalar_select %p1786_p6, 1, 0 }
  0x10   : > { %p1791_p8 = pnand %p1201_p5, %p113_p7  ;;  %s1710_s22 = smov [#allocation7]  }
  0x11   : > { %s125_s23 = sshll.u32 %s1710_s22, 4  ;;  %s28_s25 = sadd.s32 1, %s1704_s13  ;;  %s126_s23 = int_to_ptr.vmem [resolvable:$true] %s125_s23 }
  0x12   : > { %s2115_s21 = scalar_select %p1791_p8, 1, 0 }
  0x13   : > { %p1426_p9 = pneg %p1791_p8  ;;  %s1564_s28 = scalar_lea.hbm %s2105_s1, 512 }
  0x14   : > { %p1565_p12 = scmp.ne.s32.totalorder %s2105_s1, %s1564_s28  ;;  %p1571_p5 = scmp.lt.u32.totalorder %s1564_s28, %s2105_s1 }
  0x15   : > { %p1800_p11 = pnand %p1426_p9, %p1771_p1 }
  0x17   : > { %p1566_p13 = pneg %p1800_p11 }
  0x19   : > { %p1567_p0 = pnand %p1566_p13, %p1565_p12 }
  0x1b   : > { %p1568_p3 = pneg %p1567_p0 }
  0x1d   : > { %p1573_p7 = pnand %p1571_p5, %p1568_p3 }
  0x1f   : > { %1576 = shalt.err (!%p1573_p7)
}
  0x20   : > { %s1577_s5 = scalar_lea.vmem %s126_s23, 512  ;;  %p1585_p1 = scmp.lt.s32.totalorder %s126_s23, %s126_s23 }
  0x21   : > { %p1578_p9 = scmp.ne.s32.totalorder %s126_s23, %s1577_s5  ;;  %p1586_p4 = scmp.lt.s32.totalorder %s1577_s5, %s1577_s5 }
  0x23   : > { %p1580_p10 = pnand %p1578_p9, %p1566_p13  ;;  %p1587_p8 = por %p1586_p4, %p1585_p1 }
  0x25   : > { %p1581_p6 = pneg %p1580_p10 }
  0x27   : > { %p1588_p2 = pnand %p1587_p8, %p1581_p6 }
  0x29   : > { %1591 = shalt.err (!%p1588_p2)
}
  0x2a   : > { %s1711_s6 = smov 128   ;;  %s1712_s7 = smov 8  }
  0x2b   : > { %1429 = dma.hbm_to_vmem [thread:$0]  (!%p1800_p11), %s2105_s1, 512, %s126_s23, [#allocation8], %s1711_s6, %s1711_s6, %s1712_s7  }
  0x2c   : > { %p29_p1 = scmp.ge.s32.totalorder %s28_s25, 2  ;;  %s40_s16 = sadd.s32 1, %s1696_s11 }
  0x2d   : > { %p47_p2 = scmp.ne.s32.totalorder %s1696_s11, %s1692_s10  ;;  %p48_p4 = scmp.eq.s32.totalorder %s1708_s14, 0 }
  0x2e   : > { %s2132_s25 = smov (%p29_p1, %s28_s25), 0  ;;  %p2118_p8 = scmp.ne.s32.totalorder %s2112_s18, 0 }
  0x2f   : > { %p1830_p6 = por %p48_p4, %p47_p2  ;;  %s35_s26 = ssub.s32 %s1704_s13, %s2132_s25 }
  0x30   : > { %p1836_p10 = por %p2118_p8, %p47_p2  ;;  %p1439_p12 = scmp.lt.s32.totalorder %s1708_s14, 2 }
  0x31   : > { %p38_p11 = scmp.eq.s32.totalorder %s35_s26, 0  ;;  %s139_s23 = sand.u32 1, %s1696_s11  }
  0x32   : > { %s1204_s27 = sshll.u32 %s139_s23, 6  ;;  %s1240_s29 = sshll.u32 %s1704_s13, 10 }
  0x33   : > { %s1845_s28 = scalar_select %p38_p11, %s1696_s11, %s40_s16  }
  0x34   : > { %s1851_s4 = scalar_lea.hbm %s2104_s0, %s1240_s29  ;;  %s143_s18 = scalar_lea.vmem [#allocation4], %s1204_s27 }
  0x35   : > { %s151_s5 = sshll.u32 %s143_s18, 4  ;;  %p1857_p13 = pnand %p1439_p12, %p1830_p6  ;;  %s1853_s5 = int_to_ptr.vmem [resolvable:$true] %s151_s5 }
  0x36   : > { %s1861_s15 = scalar_lea.sflag [#allocation5], %s139_s23  ;;  %s1592_s16 = scalar_lea.hbm %s1851_s4, 1024 }
  0x37   : > { %p1593_p0 = scmp.ne.s32.totalorder %s1851_s4, %s1592_s16  ;;  %p1594_p3 = pneg %p1857_p13 }
  0x38   : > { %s1597_s22 = scalar_lea.hbm %s2104_s0, 2048  ;;  %p1598_p9 = scmp.lt.u32.totalorder %s1851_s4, %s2104_s0 }
  0x39   : > { %p1595_p5 = pnand %p1594_p3, %p1593_p0  ;;  %p1599_p1 = scmp.lt.u32.totalorder %s1597_s22, %s1592_s16 }
  0x3a   : > { %p1601_p4 = scmp.lt.u32.totalorder %s1592_s16, %s1851_s4 }
  0x3b   : > { %p1596_p7 = pneg %p1595_p5  ;;  %p1600_p2 = por %p1599_p1, %p1598_p9 }
  0x3d   : > { %p1602_p6 = por %p1601_p4, %p1600_p2 }
  0x3f   : > { %p1603_p8 = pnand %p1602_p6, %p1596_p7 }
  0x41   : > { %1606 = shalt.err (!%p1603_p8)
}
  0x42   : > { %s1607_s23 = scalar_lea.vmem %s1853_s5, 1024  ;;  %s1713_s3 = smov [#allocation4]  }
  0x43   : > { %p1608_p12 = scmp.ne.s32.totalorder %s1853_s5, %s1607_s23  ;;  %s1612_s18 = sshll.u32 %s1713_s3, 4  ;;  %s1613_s18 = int_to_ptr.vmem [resolvable:$false] %s1612_s18 }
  0x44   : > { %s1614_s26 = scalar_lea.vmem %s1613_s18, 2048  ;;  %p1615_p5 = scmp.lt.s32.totalorder %s1853_s5, %s1613_s18 }
  0x45   : > { %p1610_p11 = pnand %p1608_p12, %p1594_p3  ;;  %p1616_p9 = scmp.lt.s32.totalorder %s1614_s26, %s1607_s23 }
  0x47   : > { %p1611_p0 = pneg %p1610_p11  ;;  %p1617_p1 = por %p1616_p9, %p1615_p5 }
  0x49   : > { %p1618_p2 = pnand %p1617_p1, %p1611_p0 }
  0x4b   : > { %1621 = shalt.err (!%p1618_p2)
}
  0x4c   : > { %1433 = dma.hbm_to_vmem [thread:$0]  (!%p1857_p13), %s1851_s4, 1024, %s1853_s5, %s1861_s15, %s1711_s6, %s1711_s6, %s1712_s7  }
  0x4d   : > { %p2121_p3 = scmp.ne.s32.totalorder %s2115_s21, 0 }
  0x4e   : > { %s1895_s16 = sand.u32 (!%p2121_p3), 1, %s1692_s10   ;;  %p2122_p7 = scmp.ne.s32.totalorder (!%p2121_p3), %s2113_s19, 0 }
  0x4f   : > { %163 = sbr.rel (%p2121_p3) target bundleno = 5741 (0x166d), region = 28  ;;  %s1208_s27 = sshll.u32 (!%p2121_p3), %s1895_s16, 6 }
  0x50   : > { %s166_s22 = scalar_lea.sflag (!%p2121_p3), [#allocation5], %s1895_s16  ;;  %s1899_s29 = scalar_lea.vmem (!%p2121_p3), [#allocation4], %s1208_s27 }
  0x56   : > { %1675 = dma.done.wait (%p2122_p7), %s166_s22, 1024  }
  0x57   : > { %1677 = vsyncadd (%p2122_p7), %s166_s22, 4294966272  ;;  %p2123_p13 = scmp.ne.s32.totalorder %s2111_s17, 0 }
  0x59   : > { %1679 = dma.done.wait (%p2123_p13), [#allocation8], 512  }
  0x5a   : > { %1681 = vsyncadd (%p2123_p13), [#allocation8], 4294966784  ;;  %s1210_s21 = sshll.u32 %s1895_s16, 4  ;;  %p1211_p4 = scmp.ne.s32.totalorder %s1700_s12, 0 }
  0x5b   : > { %s1910_s6 = scalar_lea.vmem [#allocation9], %s1210_s21  ;;  %vm199_vm0 = vcmask (!%p1211_p4), 261120   ;;  %v1714_v0 = vmov (!%p1211_p4), 0.0  }
  0x5c   : > { %198 = sbr.rel (%p1211_p4) target bundleno = 99 (0x63), region = 40  ;;  %200 = vst.msk [vmem:[#allocation2] sm:$0xff] (!%p1211_p4), %vm199_vm0, %v1714_v0  ;;  %201 = vst.msk [vmem:[#allocation3] sm:$0xff] (!%p1211_p4), %vm199_vm0, %v1714_v0 }
  0x63 PF: > { %v205_v1 = vld [vmem:[#allocation7] sm:$0xff]  ;;  %v206_v2 = vld [vmem:[#allocation7 + $0x8] sm:$0xff]  ;;  %v207_v3 = vld [vmem:[#allocation7 + $0x10] sm:$0xff]  ;;  %v1715_v4 = vmov 0.0|0.0   ;;  %vm1716_vm1 = vmmov 0   ;;  %v1717_v7 = vmov 0.0  }
  0x64   : > { %1370 = vmatprep.subr.bf16.mxu0 %v1715_v4  ;;  %v1914_v5 = vpack.c.bf16 %v206_v2, %v205_v1  ;;  %v208_v6 = vld [vmem:[#allocation7 + $0x18] sm:$0xff]  ;;  %1290 = vmatprep.mubr.msk.f32.mxu0 %vm1716_vm1, %v1717_v7  ;;  %v202_v9 = vld [vmem:[#allocation2] sm:$0xff]  ;;  %vm209_vm2 = vcmask 261120   ;;  %v204_v10 = vld [vmem:[%s1899_s29] sm:$0xff]  ;;  %s1718_s17 = smov 32   ;;  %s1719_s19 = smov 64  }
  0x65   : > { %1376 = vmatprep.subr.bf16.mxu1 %v1715_v4  ;;  %1301 = vmatprep.mubr.msk.f32.mxu1 %vm1716_vm1, %v1717_v7  ;;  %v1922_v8 = vpack.c.bf16 %v208_v6, %v207_v3  ;;  %v203_v15 = vld [vmem:[#allocation3] sm:$0xff]  ;;  %v1214_v30 = vld [vmem:[%s1899_s29 + $0x8] sm:$0xff]  ;;  %v1217_v48 = vld [vmem:[%s1899_s29 + $0x10] sm:$0xff]  ;;  %s1720_s7 = smov 96   ;;  %vm424_vm3 = vcmask 523520   ;;  %vm531_vm4 = vcmask 785920  }
  0x66   : > { %1372 = vmatpush3.bf16.msra.mxu0 %v1914_v5  ;;  %1378 = vmatpush3.bf16.msra.mxu1 %v1914_v5  ;;  %v1220_v2 = vld [vmem:[%s1899_s29 + $0x18] sm:$0xff]  ;;  %vm643_vm5 = vcmask 1048320   ;;  %s1241_s4 = sshll.u32 %s1700_s12, 8  ;;  %s1106_s5 = sshll.u32 %s1910_s6, 4  ;;  %s2053_s5 = int_to_ptr.vmem [resolvable:$true] %s1106_s5 }
  0x67   : > { %1373 = vmatprep.subr.bf16.mxu0 %v1715_v4  ;;  %1379 = vmatprep.subr.bf16.mxu1 %v1715_v4  ;;  %s2051_s30 = scalar_lea.hbm %s2106_s2, %s1241_s4  ;;  %s1090_s23 = scalar_lea.sflag [#allocation6], %s1895_s16 }
  0x68   : > { %s1622_s3 = scalar_lea.vmem %s2053_s5, 256  ;;  %s1721_s12 = smov [#allocation9]  }
  0x69   : > { %p1623_p6 = scmp.ne.s32.totalorder %s2053_s5, %s1622_s3  ;;  %s1626_s18 = sshll.u32 %s1721_s12, 4  ;;  %s1627_s18 = int_to_ptr.vmem [resolvable:$false] %s1626_s18 }
  0x6a   : > { %1375 = vmatpush3.bf16.msra.mxu0 %v1922_v8  ;;  %1381 = vmatpush3.bf16.msra.mxu1 %v1922_v8  ;;  %s1628_s26 = scalar_lea.vmem %s1627_s18, 512  ;;  %p1629_p11 = scmp.lt.s32.totalorder %s2053_s5, %s1627_s18 }
  0x6b   : > { %1382 = vmatprep.subr.bf16.mxu0 %v1715_v4  ;;  %1388 = vmatprep.subr.bf16.mxu1 %v1715_v4  ;;  %p1624_p8 = pnand %p1623_p6, %p1836_p10  ;;  %p1630_p0 = scmp.lt.s32.totalorder %s1628_s26, %s1622_s3 }
  0x6d   : > { %1291 = vmatmul.mubr.msk.f32.vlgmr.msra.gmra.mrb[0].mxu0 %vm209_vm2, %v202_v9  ;;  %p1625_p12 = pneg %p1624_p8  ;;  %p1631_p5 = por %p1630_p0, %p1629_p11 }
  0x6e   : > { %1384 = vmatpush3.bf16.msra.mxu0 %v1914_v5  ;;  %1312 = vmatprep.mubr.msk.f32.mxu0 %vm1716_vm1, %v1717_v7 }
  0x6f   : > { %1385 = vmatprep.subr.bf16.mxu0 %v1715_v4  ;;  %p1632_p9 = pnand %p1631_p5, %p1625_p12 }
  0x72   : > { %1387 = vmatpush3.bf16.msra.mxu0 %v1922_v8 }
  0x73   : > { %1394 = vmatprep.subr.bf16.mxu0 %v1715_v4 }
 0x140   : > { %v279_v11 = vpop.f32.mrb[0].mxu0 }
 0x141   : > { %v283_v12 = vadd.f32 %v279_v11, %v204_v10  ;;  %v1292_v13 = vpop.f32.mrb[1].mxu0 }
 0x143   : > { %1500 = vtanh.f32 %v283_v12  ;;  %v1213_v16 = vmul.f32 -1.442695, %v283_v12 }
 0x145   : > { %1502 = vpow2.f32 %v1213_v16 }
 0x14d   : > { %v1501_v14 = vpop.eup %1500 }
 0x14e   : > { %297 = vrot.lane.b32.xlu0 %v1501_v14, %s1718_s17 }
 0x14f   : > { %v1503_v17 = vpop.eup %1502 }
 0x150   : > { %v287_v18 = vadd.f32 1.0, %v1503_v17 }
 0x152   : > { %292 = vrot.lane.b32.xlu0 %v203_v15, %s1718_s17  ;;  %1504 = vrcp.f32 %v287_v18 }
 0x15c   : > { %v1505_v19 = vpop.eup %1504 }
 0x1c0   : > { %v298_v20 = vpop.permute.xlu0 %297 }
 0x1c1   : > { %v300_v21 = vmul.f32 %v1505_v19, %v298_v20 }
 0x1c3   : > { %302 = vrot.lane.b32.xlu1 %v300_v21, %s1718_s17 }
 0x1c4   : > { %v293_v22 = vpop.permute.xlu0 %292 }
 0x1c5   : > { %v295_v23 = vmul.f32 %v1505_v19, %v293_v22 }
 0x235   : > { %v303_v24 = vpop.permute.xlu1 %302 }
 0x236   : > { %v305_v25 = vadd.f32 %v303_v24, %v295_v23  ;;  %v1223_v24 = vld [vmem:[%s1899_s29 + $0x20] sm:$0xff] }
 0x238   : > { %1506 = vtanh.f32 %v305_v25 }
 0x242   : > { %v1507_v26 = vpop.eup %1506 }
 0x243   : > { %308 = vrot.lane.b32.xlu1 %v1507_v26, %s1718_s17 }
 0x2b5   : > { %v309_v27 = vpop.permute.xlu1 %308 }
 0x2b6   : > { %v311_v28 = vmul.f32 %v1505_v19, %v309_v27 }
 0x2b8   : > { %313 = vrot.lane.b32.xlu0 %v311_v28, %s1719_s19 }
 0x32a   : > { %v314_v29 = vpop.permute.xlu0 %313 }
 0x32b   : > { %316 = vst.msk [vmem:[%s1910_s6] sm:$0xff] %vm209_vm2, %v314_v29  ;;  %1302 = vmatmul.mubr.msk.f32.vlgmr.msra.gmra.mrb[0].mxu1 %vm209_vm2, %v314_v29 }
 0x32c   : > { %1390 = vmatpush3.bf16.msra.mxu1 %v1914_v5  ;;  %1323 = vmatprep.mubr.msk.f32.mxu1 %vm1716_vm1, %v1717_v7 }
 0x32d   : > { %1391 = vmatprep.subr.bf16.mxu1 %v1715_v4 }
 0x330   : > { %1393 = vmatpush3.bf16.msra.mxu1 %v1922_v8 }
 0x331   : > { %1400 = vmatprep.subr.bf16.mxu1 %v1715_v4 }
 0x3fe   : > { %v391_v31 = vpop.f32.mrb[0].mxu1 }
 0x3ff   : > { %v395_v32 = vadd.f32 %v1214_v30, %v391_v31  ;;  %v1303_v33 = vpop.f32.mrb[1].mxu1 }
 0x401   : > { %1508 = vtanh.f32 %v395_v32  ;;  %v1216_v35 = vmul.f32 -1.442695, %v395_v32 }
 0x403   : > { %1510 = vpow2.f32 %v1216_v35 }
 0x40b   : > { %v1509_v34 = vpop.eup %1508 }
 0x40c   : > { %405 = vrot.lane.b32.xlu1 %v1509_v34, %s1718_s17 }
 0x40d   : > { %v1511_v36 = vpop.eup %1510 }
 0x40e   : > { %v399_v37 = vadd.f32 1.0, %v1511_v36 }
 0x410   : > { %1512 = vrcp.f32 %v399_v37 }
 0x41a   : > { %v1513_v38 = vpop.eup %1512 }
 0x41b   : > { %v403_v41 = vmul.f32 %v1513_v38, %v305_v25 }
 0x47e   : > { %v406_v39 = vpop.permute.xlu1 %405 }
 0x47f   : > { %v408_v40 = vmul.f32 %v1513_v38, %v406_v39 }
 0x481   : > { %410 = vrot.lane.b32.xlu0 %v408_v40, %s1718_s17 }
 0x4f3   : > { %v411_v42 = vpop.permute.xlu0 %410 }
 0x4f4   : > { %v413_v43 = vadd.f32 %v411_v42, %v403_v41  ;;  %v1226_v42 = vld [vmem:[%s1899_s29 + $0x28] sm:$0xff] }
 0x4f6   : > { %1514 = vtanh.f32 %v413_v43 }
 0x500   : > { %v1515_v44 = vpop.eup %1514 }
 0x501   : > { %416 = vrot.lane.b32.xlu1 %v1515_v44, %s1718_s17 }
 0x573   : > { %v417_v45 = vpop.permute.xlu1 %416 }
 0x574   : > { %v1957_v46 = vmul.f32 %v1513_v38, %v417_v45 }
 0x576   : > { %432 = vrot.lane.b32.xlu0 %v1957_v46, %s1719_s19 }
 0x5e8   : > { %v433_v47 = vpop.permute.xlu0 %432 }
 0x5e9   : > { %1313 = vmatmul.mubr.msk.f32.vlgmr.msra.gmra.mrb[2].mxu0 %vm209_vm2, %v433_v47 }
 0x5ea   : > { %1396 = vmatpush3.bf16.msra.mxu0 %v1914_v5  ;;  %1334 = vmatprep.mubr.msk.f32.mxu0 %vm1716_vm1, %v1717_v7 }
 0x5eb   : > { %1397 = vmatprep.subr.bf16.mxu0 %v1715_v4 }
 0x5ee   : > { %1399 = vmatpush3.bf16.msra.mxu0 %v1922_v8 }
 0x5ef   : > { %1406 = vmatprep.subr.bf16.mxu0 %v1715_v4 }
 0x6bc   : > { %v502_v49 = vpop.f32.mrb[2].mxu0 }
 0x6bd   : > { %v506_v50 = vadd.f32 %v1217_v48, %v502_v49  ;;  %v1314_v51 = vpop.f32.mrb[3].mxu0 }
 0x6bf   : > { %1516 = vtanh.f32 %v506_v50  ;;  %v1219_v53 = vmul.f32 -1.442695, %v506_v50 }
 0x6c1   : > { %1518 = vpow2.f32 %v1219_v53 }
 0x6c9   : > { %v1517_v52 = vpop.eup %1516 }
 0x6ca   : > { %516 = vrot.lane.b32.xlu1 %v1517_v52, %s1718_s17 }
 0x6cb   : > { %v1519_v54 = vpop.eup %1518 }
 0x6cc   : > { %v510_v55 = vadd.f32 1.0, %v1519_v54 }
 0x6ce   : > { %1520 = vrcp.f32 %v510_v55 }
 0x6d8   : > { %v1521_v56 = vpop.eup %1520 }
 0x6d9   : > { %v514_v59 = vmul.f32 %v1521_v56, %v413_v43 }
 0x73c   : > { %v517_v57 = vpop.permute.xlu1 %516 }
 0x73d   : > { %v519_v58 = vmul.f32 %v1521_v56, %v517_v57  ;;  %v1229_v57 = vld [vmem:[%s1899_s29 + $0x30] sm:$0xff] }
 0x73f   : > { %521 = vrot.lane.b32.xlu0 %v519_v58, %s1718_s17 }
 0x7b1   : > { %v522_v60 = vpop.permute.xlu0 %521 }
 0x7b2   : > { %v524_v61 = vadd.f32 %v522_v60, %v514_v59 }
 0x7b4   : > { %1522 = vtanh.f32 %v524_v61 }
 0x7be   : > { %v1523_v62 = vpop.eup %1522 }
 0x7bf   : > { %527 = vrot.lane.b32.xlu1 %v1523_v62, %s1718_s17 }
 0x831   : > { %v528_v63 = vpop.permute.xlu1 %527 }
 0x832   : > { %v1972_v0 = vmul.f32 %v1521_v56, %v528_v63 }
 0x834   : > { %540 = vrot.lane.b32.xlu0 %v1972_v0, %s1719_s19 }
 0x8a6   : > { %v541_v1 = vpop.permute.xlu0 %540 }
 0x8a7   : > { %1324 = vmatmul.mubr.msk.f32.vlgmr.msra.gmra.mrb[2].mxu1 %vm209_vm2, %v541_v1 }
 0x8a8   : > { %1402 = vmatpush3.bf16.msra.mxu1 %v1914_v5  ;;  %1345 = vmatprep.mubr.msk.f32.mxu1 %vm1716_vm1, %v1717_v7 }
 0x8a9   : > { %1403 = vmatprep.subr.bf16.mxu1 %v1715_v4 }
 0x8ac   : > { %1405 = vmatpush3.bf16.msra.mxu1 %v1922_v8 }
 0x8ad   : > { %1412 = vmatprep.subr.bf16.mxu1 %v1715_v4 }
 0x97a   : > { %v610_v3 = vpop.f32.mrb[2].mxu1 }
 0x97b   : > { %v614_v6 = vadd.f32 %v1220_v2, %v610_v3  ;;  %v1325_v9 = vpop.f32.mrb[3].mxu1 }
 0x97d   : > { %1524 = vtanh.f32 %v614_v6  ;;  %v1222_v11 = vmul.f32 -1.442695, %v614_v6 }
 0x97f   : > { %1526 = vpow2.f32 %v1222_v11 }
 0x987   : > { %v1525_v10 = vpop.eup %1524 }
 0x988   : > { %624 = vrot.lane.b32.xlu1 %v1525_v10, %s1718_s17 }
 0x989   : > { %v1527_v12 = vpop.eup %1526 }
 0x98a   : > { %v618_v13 = vadd.f32 1.0, %v1527_v12 }
 0x98c   : > { %1528 = vrcp.f32 %v618_v13 }
 0x996   : > { %v1529_v14 = vpop.eup %1528 }
 0x997   : > { %v622_v17 = vmul.f32 %v1529_v14, %v524_v61 }
 0x9fa   : > { %v625_v15 = vpop.permute.xlu1 %624 }
 0x9fb   : > { %v627_v16 = vmul.f32 %v1529_v14, %v625_v15 }
 0x9fd   : > { %629 = vrot.lane.b32.xlu0 %v627_v16, %s1718_s17  ;;  %v1232_v16 = vld [vmem:[%s1899_s29 + $0x38] sm:$0xff] }
 0xa6f   : > { %v630_v18 = vpop.permute.xlu0 %629 }
 0xa70   : > { %v632_v19 = vadd.f32 %v630_v18, %v622_v17 }
 0xa72   : > { %1530 = vtanh.f32 %v632_v19 }
 0xa7c   : > { %v1531_v20 = vpop.eup %1530 }
 0xa7d   : > { %635 = vrot.lane.b32.xlu1 %v1531_v20, %s1718_s17 }
 0xaef   : > { %v636_v21 = vpop.permute.xlu1 %635 }
 0xaf0   : > { %v1987_v22 = vmul.f32 %v1529_v14, %v636_v21 }
 0xaf2   : > { %651 = vrot.lane.b32.xlu0 %v1987_v22, %s1719_s19 }
 0xb64   : > { %v652_v23 = vpop.permute.xlu0 %651 }
 0xb65   : > { %1335 = vmatmul.mubr.msk.f32.vlgmr.msra.gmra.mrb[4].mxu0 %vm209_vm2, %v652_v23 }
 0xb66   : > { %1408 = vmatpush3.bf16.msra.mxu0 %v1914_v5  ;;  %1356 = vmatprep.mubr.msk.f32.mxu0 %vm1716_vm1, %v1717_v7 }
 0xb67   : > { %1409 = vmatprep.subr.bf16.mxu0 %v1715_v4 }
 0xb6a   : > { %1411 = vmatpush3.bf16.msra.mxu0 %v1922_v8 }
 0xc38   : > { %v721_v25 = vpop.f32.mrb[4].mxu0 }
 0xc39   : > { %v725_v26 = vadd.f32 %v1223_v24, %v721_v25  ;;  %v1336_v27 = vpop.f32.mrb[5].mxu0 }
 0xc3b   : > { %1532 = vtanh.f32 %v725_v26  ;;  %v1225_v29 = vmul.f32 -1.442695, %v725_v26 }
 0xc3d   : > { %1534 = vpow2.f32 %v1225_v29 }
 0xc45   : > { %v1533_v28 = vpop.eup %1532 }
 0xc46   : > { %735 = vrot.lane.b32.xlu1 %v1533_v28, %s1718_s17 }
 0xc47   : > { %v1535_v30 = vpop.eup %1534 }
 0xc48   : > { %v729_v31 = vadd.f32 1.0, %v1535_v30 }
 0xc4a   : > { %1536 = vrcp.f32 %v729_v31 }
 0xc54   : > { %v1537_v32 = vpop.eup %1536 }
 0xc55   : > { %v733_v35 = vmul.f32 %v1537_v32, %v632_v19 }
 0xcb8   : > { %v736_v33 = vpop.permute.xlu1 %735 }
 0xcb9   : > { %v738_v34 = vmul.f32 %v1537_v32, %v736_v33 }
 0xcbb   : > { %740 = vrot.lane.b32.xlu0 %v738_v34, %s1718_s17 }
 0xd2d   : > { %v741_v36 = vpop.permute.xlu0 %740 }
 0xd2e   : > { %v743_v37 = vadd.f32 %v741_v36, %v733_v35 }
 0xd30   : > { %1538 = vtanh.f32 %v743_v37 }
 0xd3a   : > { %v1539_v38 = vpop.eup %1538 }
 0xd3b   : > { %746 = vrot.lane.b32.xlu1 %v1539_v38, %s1718_s17 }
 0xdad   : > { %v747_v39 = vpop.permute.xlu1 %746 }
 0xdae   : > { %v749_v40 = vmul.f32 %v1537_v32, %v747_v39 }
 0xdb0   : > { %751 = vrot.lane.b32.xlu0 %v749_v40, %s1719_s19 }
 0xe22   : > { %v752_v41 = vpop.permute.xlu0 %751 }
 0xe23   : > { %754 = vst.msk [vmem:[%s1910_s6 + $0x8] sm:$0xff] %vm209_vm2, %v752_v41  ;;  %1346 = vmatmul.mubr.msk.f32.vlgmr.msra.gmra.mrb[4].mxu1 %vm209_vm2, %v752_v41 }
 0xe24   : > { %1414 = vmatpush3.bf16.msra.mxu1 %v1914_v5  ;;  %1367 = vmatprep.mubr.msk.f32.mxu1 %vm1716_vm1, %v1717_v7 }
 0xe25   : > { %1415 = vmatprep.subr.bf16.mxu1 %v1715_v4 }
 0xe28   : > { %1417 = vmatpush3.bf16.msra.mxu1 %v1922_v8 }
 0xef6   : > { %v829_v43 = vpop.f32.mrb[4].mxu1 }
 0xef7   : > { %v833_v44 = vadd.f32 %v1226_v42, %v829_v43  ;;  %v1347_v45 = vpop.f32.mrb[5].mxu1 }
 0xef9   : > { %1540 = vtanh.f32 %v833_v44  ;;  %v1228_v48 = vmul.f32 -1.442695, %v833_v44 }
 0xefb   : > { %1542 = vpow2.f32 %v1228_v48 }
 0xf03   : > { %v1541_v47 = vpop.eup %1540 }
 0xf04   : > { %843 = vrot.lane.b32.xlu1 %v1541_v47, %s1718_s17 }
 0xf05   : > { %v1543_v49 = vpop.eup %1542 }
 0xf06   : > { %v837_v50 = vadd.f32 1.0, %v1543_v49 }
 0xf08   : > { %1544 = vrcp.f32 %v837_v50 }
 0xf12   : > { %v1545_v5 = vpop.eup %1544 }
 0xf13   : > { %v841_v4 = vmul.f32 %v1545_v5, %v743_v37 }
 0xf76   : > { %v844_v7 = vpop.permute.xlu1 %843 }
 0xf77   : > { %v846_v51 = vmul.f32 %v1545_v5, %v844_v7 }
 0xf79   : > { %848 = vrot.lane.b32.xlu0 %v846_v51, %s1718_s17 }
 0xfeb   : > { %v849_v8 = vpop.permute.xlu0 %848 }
 0xfec   : > { %v851_v52 = vadd.f32 %v849_v8, %v841_v4 }
 0xfee   : > { %1546 = vtanh.f32 %v851_v52 }
 0xff8   : > { %v1547_v53 = vpop.eup %1546 }
 0xff9   : > { %854 = vrot.lane.b32.xlu1 %v1547_v53, %s1718_s17 }
0x106b   : > { %v855_v54 = vpop.permute.xlu1 %854 }
0x106c   : > { %v2014_v55 = vmul.f32 %v1545_v5, %v855_v54 }
0x106e   : > { %869 = vrot.lane.b32.xlu0 %v2014_v55, %s1719_s19 }
0x10e0   : > { %v870_v56 = vpop.permute.xlu0 %869 }
0x10e1   : > { %1357 = vmatmul.mubr.msk.f32.vlgmr.msra.gmra.mrb[6].mxu0 %vm209_vm2, %v870_v56 }
0x11b4   : > { %v939_v58 = vpop.f32.mrb[6].mxu0 }
0x11b5   : > { %v943_v59 = vadd.f32 %v1229_v57, %v939_v58  ;;  %v1358_v60 = vpop.f32.mrb[7].mxu0 }
0x11b7   : > { %1548 = vtanh.f32 %v943_v59  ;;  %v1231_v62 = vmul.f32 -1.442695, %v943_v59 }
0x11b9   : > { %1550 = vpow2.f32 %v1231_v62 }
0x11c1   : > { %v1549_v61 = vpop.eup %1548 }
0x11c2   : > { %953 = vrot.lane.b32.xlu1 %v1549_v61, %s1718_s17 }
0x11c3   : > { %v1551_v63 = vpop.eup %1550 }
0x11c4   : > { %v947_v1 = vadd.f32 1.0, %v1551_v63 }
0x11c6   : > { %1552 = vrcp.f32 %v947_v1 }
0x11d0   : > { %v1553_v2 = vpop.eup %1552 }
0x11d1   : > { %v951_v9 = vmul.f32 %v1553_v2, %v851_v52 }
0x1234   : > { %v954_v3 = vpop.permute.xlu1 %953 }
0x1235   : > { %v956_v6 = vmul.f32 %v1553_v2, %v954_v3 }
0x1237   : > { %958 = vrot.lane.b32.xlu0 %v956_v6, %s1718_s17 }
0x12a9   : > { %v959_v10 = vpop.permute.xlu0 %958 }
0x12aa   : > { %v961_v11 = vadd.f32 %v959_v10, %v951_v9 }
0x12ac   : > { %1554 = vtanh.f32 %v961_v11 }
0x12b6   : > { %v1555_v12 = vpop.eup %1554 }
0x12b7   : > { %964 = vrot.lane.b32.xlu1 %v1555_v12, %s1718_s17 }
0x1329   : > { %v965_v13 = vpop.permute.xlu1 %964 }
0x132a   : > { %v967_v14 = vmul.f32 %v1553_v2, %v965_v13 }
0x132c   : > { %976 = vrot.lane.b32.xlu0 %v967_v14, %s1719_s19 }
0x139e   : > { %v977_v15 = vpop.permute.xlu0 %976 }
0x139f   : > { %1368 = vmatmul.mubr.msk.f32.vlgmr.msra.gmra.mrb[6].mxu1 %vm209_vm2, %v977_v15 }
0x1472   : > { %v1046_v17 = vpop.f32.mrb[6].mxu1 }
0x1473   : > { %v1050_v18 = vadd.f32 %v1232_v16, %v1046_v17  ;;  %v1369_v19 = vpop.f32.mrb[7].mxu1 }
0x1475   : > { %1556 = vtanh.f32 %v1050_v18  ;;  %v1234_v21 = vmul.f32 -1.442695, %v1050_v18 }
0x1477   : > { %1558 = vpow2.f32 %v1234_v21 }
0x147f   : > { %v1557_v20 = vpop.eup %1556 }
0x1480   : > { %1060 = vrot.lane.b32.xlu1 %v1557_v20, %s1718_s17 }
0x1481   : > { %v1559_v23 = vpop.eup %1558 }
0x1482   : > { %v1054_v24 = vadd.f32 1.0, %v1559_v23 }
0x1484   : > { %1560 = vrcp.f32 %v1054_v24 }
0x148e   : > { %v1561_v25 = vpop.eup %1560 }
0x148f   : > { %v1058_v28 = vmul.f32 %v1561_v25, %v961_v11 }
0x14f2   : > { %v1061_v26 = vpop.permute.xlu1 %1060 }
0x14f3   : > { %v1063_v27 = vmul.f32 %v1561_v25, %v1061_v26 }
0x14f5   : > { %1065 = vrot.lane.b32.xlu0 %v1063_v27, %s1718_s17 }
0x14f9   : > { %421 = vrot.lane.b32.xlu0 %v1957_v46, %s1720_s7 }
0x14fd   : > { %640 = vrot.lane.b32.xlu0 %v1987_v22, %s1718_s17 }
0x1567   : > { %v1066_v29 = vpop.permute.xlu0 %1065 }
0x1568   : > { %v1068_v30 = vadd.f32 %v1066_v29, %v1058_v28 }
0x156a   : > { %1562 = vtanh.f32 %v1068_v30 }
0x156b   : > { %v422_v31 = vpop.permute.xlu0 %421 }
0x156c   : > { %425 = vst.msk [vmem:[%s1910_s6] sm:$0xff] %vm424_vm3, %v422_v31 }
0x156d   : > { %532 = vst.msk [vmem:[%s1910_s6] sm:$0xff] %vm531_vm4, %v1972_v0 }
0x156f   : > { %v641_v46 = vpop.permute.xlu0 %640 }
0x1570   : > { %644 = vst.msk [vmem:[%s1910_s6] sm:$0xff] %vm643_vm5, %v641_v46 }
0x1574   : > { %v1563_v22 = vpop.eup %1562 }
0x1575   : > { %1071 = vrot.lane.b32.xlu1 %v1563_v22, %s1718_s17 }
0x1579   : > { %859 = vrot.lane.b32.xlu1 %v2014_v55, %s1720_s7 }
0x15e7   : > { %v1072_v32 = vpop.permute.xlu1 %1071 }
0x15e8   : > { %v1074_v33 = vmul.f32 %v1561_v25, %v1072_v32 }
0x15ea   : > { %1080 = vrot.lane.b32.xlu0 %v1074_v33, %s1719_s19  ;;  %1076 = vrot.lane.b32.xlu1 %v1074_v33, %s1718_s17 }
0x15eb   : > { %v860_v0 = vpop.permute.xlu1 %859 }
0x15ec   : > { %862 = vst.msk [vmem:[%s1910_s6 + $0x8] sm:$0xff] %vm424_vm3, %v860_v0 }
0x15ed   : > { %968 = vst.msk [vmem:[%s1910_s6 + $0x8] sm:$0xff] %vm531_vm4, %v967_v14 }
0x15ee   : > { %1085 = vrot.lane.b32.xlu1 %v1068_v30, %s1720_s7 }
0x165c   : > { %v1081_v34 = vpop.permute.xlu0 %1080  ;;  %v1077_v35 = vpop.permute.xlu1 %1076 }
0x165d   : > { %1083 = vst.msk [vmem:[#allocation2] sm:$0xff] %vm209_vm2, %v1081_v34 }
0x165e   : > { %1079 = vst.msk [vmem:[%s1910_s6 + $0x8] sm:$0xff] %vm643_vm5, %v1077_v35 }
0x165f   : > { %1635 = shalt.err (!%p1632_p9)
}
0x1660   : > { %s1636_s16 = scalar_lea.hbm %s2051_s30, 256  ;;  %s1640_s29 = scalar_lea.hbm %s2106_s2, 512 }
0x1661   : > { %p1637_p1 = scmp.ne.s32.totalorder %s2051_s30, %s1636_s16  ;;  %p1641_p7 = scmp.lt.u32.totalorder %s2051_s30, %s2106_s2 }
0x1662   : > { %p1642_p13 = scmp.lt.u32.totalorder %s1640_s29, %s1636_s16  ;;  %p1644_p6 = scmp.lt.u32.totalorder %s1636_s16, %s2051_s30 }
0x1663   : > { %p1638_p2 = pnand %p1637_p1, %p1836_p10 }
0x1664   : > { %p1643_p4 = por %p1642_p13, %p1641_p7 }
0x1665   : > { %p1639_p3 = pneg %p1638_p2 }
0x1666   : > { %p1645_p8 = por %p1644_p6, %p1643_p4 }
0x1668   : > { %p1646_p12 = pnand %p1645_p8, %p1639_p3 }
0x166a   : > { %1649 = shalt.err (!%p1646_p12)
}
0x166b   : > { %1424 = dma.vmem_to_hbm [thread:$0]  (%p1836_p10), %s2053_s5, 256, %s2051_s30, %s1090_s23   ;;  %v1086_v36 = vpop.permute.xlu1 %1085 }
0x166c   : > { %1088 = vst.msk [vmem:[#allocation3] sm:$0xff] %vm209_vm2, %v1086_v36 }
0x166d PF: > { %s1118_s17 = sand.u32 1, %s1688_s9   ;;  %p2124_p11 = scmp.ne.s32.totalorder %s2114_s20, 0 }
0x166e   : > { %p2125_p0 = scmp.ge.s32.totalorder %s1708_s14, 2  ;;  %s1119_s19 = scalar_lea.sflag [#allocation6], %s1118_s17 }
0x1670   : > { %p1435_p5 = pnand %p2125_p0, %p2124_p11 }
0x1672   : > { %1683 = dma.done.wait (!%p1435_p5), %s1119_s19, 256  }
0x1673   : > { %1685 = vsyncadd (!%p1435_p5), %s1119_s19, 4294967040  ;;  %s19_s14 = sadd.s32 1, %s1708_s14   ;;  %s2126_s9 = smov %s1692_s10 }
0x1674   : > { %p16_p9 = scmp.ge.s32.totalorder %s19_s14, 4   ;;  %s2127_s10 = smov %s1696_s11 }
0x1675   : > { %s2128_s11 = smov %s1845_s28  ;;  %s2129_s12 = smov %s1704_s13 }
0x1676   : > { %s2130_s13 = smov %s2132_s25  ;;  %18 = sbr.rel (!%p16_p9) target bundleno = 7 (0x7), region = 88 }
0x167d   :  { %1124 = vsyncpa [#allocation5], 1 }
0x167e   :  { %1126 = vsyncpa [#allocation5 + $0x1], 1 }
0x167f   :  { %1127 = vsyncpa [#allocation8], 1 }
0x1680   :  { %1128 = vsyncpa [#allocation6], 1 }
0x1681   :  { %1130 = vsyncpa [#allocation6 + $0x1], 1 }

</bundles_post_ra>
